<compile_context>
chip_gen: v6e
topology: v6e:2x2x1
jax: 0.10.0
libtpu: 0.0.40
codegen_flags: <defaults>
</compile_context>

<pallas_src>
import jax
import jax.numpy as jnp
from jax.experimental import pallas as pl
from jax.experimental.pallas import tpu as pltpu


def _round_up(x, m):
    return ((x + m - 1) // m) * m


# ---------------------------------------------------------------------------
# Tile selection for the fused prompt kernel.
# ---------------------------------------------------------------------------
def _choose_tiles(L, hidden, n_groups, batch_size, in_itemsize, out_itemsize,
                  n_in_tables, n_outputs):
    # hb = (layer, kv) groups per D-block: smallest divisor of n_groups whose lane width
    # hb*hidden is a multiple of 128; fall back to the full D extent (always legal).
    hb = n_groups
    for cand in range(1, n_groups + 1):
        if n_groups % cand == 0 and (cand * hidden) % 128 == 0:
            hb = cand
            break
    Lb = L  # prefix length is small by construction (prefix tuning); full-L blocks.
    in_bytes = n_in_tables * Lb * hb * hidden * in_itemsize
    per_batch_out = n_outputs * hb * Lb * hidden * out_itemsize
    budget = 6 * 1024 * 1024   # per buffer set; x2 double-buffering stays < v5e's 16 MiB default
    Bb = 1
    for d in range(batch_size, 0, -1):
        if batch_size % d == 0 and in_bytes + d * per_batch_out <= budget:
            Bb = d
            break
    live_est = 2 * (in_bytes + Bb * per_batch_out)   # double-buffered live-bytes estimate
    return hb, Lb, Bb, live_est


# ---------------------------------------------------------------------------
# Fused kernel: prefix averaging + batch broadcast + past_key_values permute.
#   avg_out[g, b, h, l, e]   = 0.5*(share[l, g*hidden + h*n_embd + e] + k[l, ...])
#   share_out[g, b, h, l, e] =      share[l, g*hidden + h*n_embd + e]
# which is exactly torch's .view(B, L, 2*n_layer, n_head, n_embd).permute([2,0,3,1,4]).
# ---------------------------------------------------------------------------
def prefix_prompt_layouts(emb_share, emb_k, batch_size, n_layer, n_head, *, out_dtype=None):
    """Returns (avg_pkv, share_pkv), each (n_layer, 2, B, n_head, L, n_embd).

    If emb_k is None (unknown topic), both outputs are the share-only prompt, matching
    the torch fallback `past_key_values_avg = past_key_values_share`.
    """
    L, D = emb_share.shape
    n_groups = n_layer * 2
    hidden = D // n_groups
    n_embd = hidden // n_head
    assert n_groups * hidden == D and n_head * n_embd == hidden
    if emb_k is not None:
        assert emb_k.shape == emb_share.shape
    out_dtype = jnp.dtype(out_dtype) if out_dtype is not None else emb_share.dtype

    two_tables = emb_k is not None
    n_outputs = 2 if two_tables else 1
    hb, Lb, Bb, live_est = _choose_tiles(
        L, hidden, n_groups, batch_size,
        emb_share.dtype.itemsize, out_dtype.itemsize,
        2 if two_tables else 1, n_outputs)

    grid = (n_groups // hb, L // Lb, batch_size // Bb)
    in_spec = pl.BlockSpec((Lb, hb * hidden), lambda g, lt, bt: (lt, g))
    out_spec = pl.BlockSpec((hb, Bb, n_head, Lb, n_embd),
                            lambda g, lt, bt: (g, bt, 0, lt, 0))
    out_sds = jax.ShapeDtypeStruct((n_groups, batch_size, n_head, L, n_embd), out_dtype)

    vmem_limit = None
    if live_est > 12 * 1024 * 1024:   # would risk v5e's 16 MiB default scoped VMEM limit
        vmem_limit = min(int(live_est * 1.5), 56 * 1024 * 1024)   # stay under v7x physical 64 MiB
    cparams = pltpu.CompilerParams(
        dimension_semantics=("parallel", "parallel", "parallel"),
        vmem_limit_bytes=vmem_limit)

    def _store_heads(src, dst_ref):
        # src: (Lb, hb*hidden) f32 tile.  Static (small) loops over (layer,kv) groups and
        # heads: static lane-slices + major-dim indexed stores only; the batch broadcast is
        # done in-register so the HBM write is the only data movement for the output.
        for gg in range(hb):
            for h in range(n_head):
                c0 = gg * hidden + h * n_embd
                sl = src[:, c0:c0 + n_embd]                       # (Lb, n_embd)
                dst_ref[gg, :, h, :, :] = jnp.broadcast_to(
                    sl[None], (Bb, Lb, n_embd)).astype(dst_ref.dtype)

    if two_tables:
        def kernel(share_ref, k_ref, avg_ref, adv_ref):
            s = share_ref[...].astype(jnp.float32)
            a = (s + k_ref[...].astype(jnp.float32)) * 0.5
            _store_heads(a, avg_ref)      # averaged prompt -> main PLM path
            _store_heads(s, adv_ref)      # share-only prompt -> adversarial path
        avg5, adv5 = pl.pallas_call(
            kernel,
            out_shape=(out_sds, out_sds),
            grid=grid,
            in_specs=[in_spec, in_spec],
            out_specs=(out_spec, out_spec),
            compiler_params=cparams,
        )(emb_share, emb_k)
    else:
        def kernel(share_ref, adv_ref):
            _store_heads(share_ref[...].astype(jnp.float32), adv_ref)
        adv5 = pl.pallas_call(
            kernel,
            out_shape=out_sds,
            grid=grid,
            in_specs=[in_spec],
            out_specs=out_spec,
            compiler_params=cparams,
        )(emb_share)
        avg5 = adv5

    shape6 = (n_layer, 2, batch_size, n_head, L, n_embd)
    # Splitting the leading dim (n_layer*2) -> (n_layer, 2) is a free contiguous reshape.
    return avg5.reshape(shape6), adv5.reshape(shape6)


# ---------------------------------------------------------------------------
# Adversarial head: adv_logits = adv_outputs @ W^T + b (nn.Linear).
# Weight is lane-padded to a 128-column multiple (zero columns -> identical logits),
# full-extent blocks, no batch padding/slicing.
# ---------------------------------------------------------------------------
def _fc_kernel(x_ref, w_ref, b_ref, o_ref):
    o_ref[...] = (
        jnp.dot(x_ref[...], w_ref[...], preferred_element_type=jnp.float32)
        + b_ref[...]
    ).astype(o_ref.dtype)


def fc_linear(x, w_t_pad, b_pad, n_out):
    # TODO(synk): at these sizes (a few rows, issue_num ~4-16) this Linear is launch-overhead
    # dominated; in production leave it to XLA / fuse it into the PLM pooled-output epilogue.
    B, H = x.shape
    Np = w_t_pad.shape[1]
    out = pl.pallas_call(
        _fc_kernel,
        out_shape=jax.ShapeDtypeStruct((B, Np), jnp.float32),
    )(x, w_t_pad, b_pad)
    return out[:, :n_out]


# ---------------------------------------------------------------------------
# Model: parameter setup + glue (mask concat) in plain JAX.
# ---------------------------------------------------------------------------
class PrefixShareAdvMLMPallas:
    def __init__(self, key, pre_seq_len, issue_num, num_hidden_layers,
                 num_attention_heads, hidden_size):
        self.pre_seq_len = dict(pre_seq_len)
        self.n_layer = num_hidden_layers
        self.n_head = num_attention_heads
        self.n_embd = hidden_size // num_attention_heads
        self.hidden_size = hidden_size
        self.issue_num = issue_num

        keys = jax.random.split(key, len(pre_seq_len) + 1)
        # PrefixEncoder (prefix_projection=False): nn.Embedding(L, n_layer*2*hidden), N(0,1) init.
        self.prefix_embeddings = {}
        for i, kk in enumerate(sorted(self.pre_seq_len)):
            self.prefix_embeddings[kk] = jax.random.normal(
                keys[i],
                (self.pre_seq_len[kk], num_hidden_layers * 2 * hidden_size),
                dtype=jnp.float32)
        # fc = nn.Linear(hidden, issue_num): xavier_uniform weight, zero bias (_init_fc_weights).
        bound = (6.0 / (hidden_size + issue_num)) ** 0.5
        w = jax.random.uniform(keys[-1], (issue_num, hidden_size),
                               minval=-bound, maxval=bound, dtype=jnp.float32)
        self.fc_w_t = w.T                                     # (hidden, issue_num) reference
        self.fc_b = jnp.zeros((1, issue_num), jnp.float32)
        n_pad = _round_up(issue_num, 128)
        self.fc_w_t_pad = (jnp.zeros((hidden_size, n_pad), jnp.float32)
                           .at[:, :issue_num].set(self.fc_w_t))
        self.fc_b_pad = jnp.zeros((1, n_pad), jnp.float32)

    def forward(self, batch, k, alpha, *, pkv_dtype=None):
        # pkv_dtype=jnp.bfloat16 halves HBM writes of the (write-bound) prompt kernel when
        # the downstream PLM consumes bf16; default keeps f32 to match torch numerics.
        input_ids = batch['input_ids']
        attention_mask = batch['attention_mask']
        batch_size = input_ids.shape[0]
        L_share = self.pre_seq_len['share']
        emb_share = self.prefix_embeddings['share']

        prefix_attention_mask_share = jnp.ones(
            (batch_size, L_share), dtype=attention_mask.dtype)
        attention_mask_share = jnp.concatenate(
            [prefix_attention_mask_share, attention_mask], axis=1)

        emb_k = self.prefix_embeddings[k] if k in self.pre_seq_len else None
        # One fused pallas_call: (share + k)/2 (when k is known), batch broadcast AND the
        # view/permute into past_key_values layout, for both the avg and adversarial paths.
        # TODO(synk): nn.Dropout(0.1) train-mode masking not modeled (eval-mode identity);
        # ReverseLayerF.apply(x, alpha) is identity in the forward pass (alpha scales grads only).
        past_key_values_avg, adv_past_key_values = prefix_prompt_layouts(
            emb_share, emb_k, batch_size, self.n_layer, self.n_head, out_dtype=pkv_dtype)

        # TODO(synk): self.plm(**input_batch), verbalizer.gather_outputs / process_outputs and
        # extract_at_mask are external dependencies with no clean Pallas equivalent here; a
        # pooled-output stand-in drives the adversarial fc head below.
        adv_outputs = batch['adv_pooled_stub']                # stands in for self.plm(...)[1]
        adv_logits = fc_linear(adv_outputs, self.fc_w_t_pad, self.fc_b_pad, self.issue_num)

        return past_key_values_avg, attention_mask_share, adv_past_key_values, adv_logits


if __name__ == "__main__":
    B, S = 2, 8
    hidden_size, n_head, n_layer, issue_num = 32, 4, 2, 4
    pre_seq_len = {'share': 8, 'topicA': 8}

    key = jax.random.PRNGKey(0)
    k_model, k_ids, k_stub = jax.random.split(key, 3)

    model = PrefixShareAdvMLMPallas(
        k_model, pre_seq_len, issue_num, n_layer, n_head, hidden_size)

    batch = {
        'input_ids': jax.random.randint(k_ids, (B, S), 0, 100),
        'attention_mask': jnp.ones((B, S), dtype=jnp.float32),
        'adv_pooled_stub': jax.random.normal(k_stub, (B, hidden_size), dtype=jnp.float32),
    }

    pkv_avg, attn_mask_share, adv_pkv, adv_logits = model.forward(batch, 'topicA', alpha=0.5)
    jax.block_until_ready(pkv_avg)
    jax.block_until_ready(adv_pkv)
    jax.block_until_ready(adv_logits)

    n_embd = hidden_size // n_head
    L = pre_seq_len['share']
    D = n_layer * 2 * hidden_size
    assert pkv_avg.shape == (n_layer, 2, B, n_head, L, n_embd)
    assert adv_pkv.shape == pkv_avg.shape
    assert attn_mask_share.shape == (B, L + S)
    assert adv_logits.shape == (B, issue_num)

    # pure-JAX reference of torch's broadcast + .view().permute([2,0,3,1,4]) layout
    def ref_layout(tbl):
        x = jnp.broadcast_to(tbl[None], (B, L, D))
        x = x.reshape(B, L, n_layer * 2, n_head, n_embd)
        x = jnp.transpose(x, (2, 0, 3, 1, 4))
        return x.reshape(n_layer, 2, B, n_head, L, n_embd)

    emb_share = model.prefix_embeddings['share']
    emb_topic = model.prefix_embeddings['topicA']
    assert jnp.allclose(pkv_avg, ref_layout((emb_share + emb_topic) * 0.5), atol=1e-6)
    assert jnp.allclose(adv_pkv, ref_layout(emb_share), atol=1e-6)

    ref_logits = batch['adv_pooled_stub'] @ model.fc_w_t + model.fc_b
    assert jnp.allclose(adv_logits, ref_logits, atol=1e-5)

    # exercise the "k not known" fallback (single-output kernel; avg == share, as in torch)
    pkv_avg2, _, adv_pkv2, _ = model.forward(batch, 'unknown_topic', alpha=0.5)
    jax.block_until_ready(pkv_avg2)
    assert jnp.allclose(pkv_avg2, ref_layout(emb_share), atol=1e-6)
    assert jnp.allclose(adv_pkv2, ref_layout(emb_share), atol=1e-6)

    print("KERNEL_OK")
</pallas_src>

<mosaic_0001>
module attributes {stable_mosaic.version = 11 : i64} {
  func.func @kernel(%arg0: i32, %arg1: i32, %arg2: i32, %arg3: memref<8x128xf32, #tpu.memory_space<vmem>>, %arg4: memref<8x128xf32, #tpu.memory_space<vmem>>, %arg5: memref<4x2x4x8x8xf32, #tpu.memory_space<vmem>>, %arg6: memref<4x2x4x8x8xf32, #tpu.memory_space<vmem>>) attributes {dimension_semantics = [#tpu.dimension_semantics<parallel>, #tpu.dimension_semantics<parallel>, #tpu.dimension_semantics<parallel>], iteration_bounds = array<i64: 1, 1, 1>, scalar_prefetch = 0 : i64, scratch_operands = 0 : i64, tpu.core_type = #tpu.core_type<tc>, window_params = [{transform_indices = @transform_0, window_bounds = array<i64: 8, 128>}, {transform_indices = @transform_1, window_bounds = array<i64: 8, 128>}, {transform_indices = @transform_2, window_bounds = array<i64: 4, 2, 4, 8, 8>}, {transform_indices = @transform_3, window_bounds = array<i64: 4, 2, 4, 8, 8>}]} {
    %c0 = arith.constant 0 : index
    %c0_0 = arith.constant 0 : index
    %0 = vector.load %arg3[%c0, %c0_0] : memref<8x128xf32, #tpu.memory_space<vmem>>, vector<8x128xf32>
    %c0_1 = arith.constant 0 : index
    %c0_2 = arith.constant 0 : index
    %1 = vector.load %arg4[%c0_1, %c0_2] : memref<8x128xf32, #tpu.memory_space<vmem>>, vector<8x128xf32>
    %2 = arith.addf %0, %1 : vector<8x128xf32>
    %cst = arith.constant 5.000000e-01 : f32
    %3 = vector.broadcast %cst : f32 to vector<8x128xf32>
    %4 = arith.mulf %2, %3 : vector<8x128xf32>
    %5 = vector.extract_strided_slice %4 {offsets = [0, 0], sizes = [8, 8], strides = [1, 1]} : vector<8x128xf32> to vector<8x8xf32>
    %6 = vector.shape_cast %5 : vector<8x8xf32> to vector<1x8x8xf32>
    %7 = vector.shape_cast %6 : vector<1x8x8xf32> to vector<1x8x8xf32>
    %8 = vector.broadcast %7 : vector<1x8x8xf32> to vector<2x8x8xf32>
    %c0_3 = arith.constant 0 : index
    %c0_4 = arith.constant 0 : index
    %c0_5 = arith.constant 0 : index
    %c0_6 = arith.constant 0 : index
    %c0_7 = arith.constant 0 : index
    %9 = vector.load %arg5[%c0_3, %c0_4, %c0_5, %c0_6, %c0_7] : memref<4x2x4x8x8xf32, #tpu.memory_space<vmem>>, vector<1x2x1x8x8xf32>
    %10 = vector.shape_cast %9 : vector<1x2x1x8x8xf32> to vector<2x8x8xf32>
    %11 = vector.shape_cast %8 : vector<2x8x8xf32> to vector<1x2x1x8x8xf32>
    tpu.vector_store %arg5[%c0_3, %c0_4, %c0_5, %c0_6, %c0_7], %11 {strides = array<i32>} : memref<4x2x4x8x8xf32, #tpu.memory_space<vmem>>, vector<1x2x1x8x8xf32>,
    %12 = vector.extract_strided_slice %4 {offsets = [0, 8], sizes = [8, 8], strides = [1, 1]} : vector<8x128xf32> to vector<8x8xf32>
    %13 = vector.shape_cast %12 : vector<8x8xf32> to vector<1x8x8xf32>
    %14 = vector.shape_cast %13 : vector<1x8x8xf32> to vector<1x8x8xf32>
    %15 = vector.broadcast %14 : vector<1x8x8xf32> to vector<2x8x8xf32>
    %c0_8 = arith.constant 0 : index
    %c0_9 = arith.constant 0 : index
    %c1 = arith.constant 1 : index
    %c0_10 = arith.constant 0 : index
    %c0_11 = arith.constant 0 : index
    %16 = vector.load %arg5[%c0_8, %c0_9, %c1, %c0_10, %c0_11] : memref<4x2x4x8x8xf32, #tpu.memory_space<vmem>>, vector<1x2x1x8x8xf32>
    %17 = vector.shape_cast %16 : vector<1x2x1x8x8xf32> to vector<2x8x8xf32>
    %18 = vector.shape_cast %15 : vector<2x8x8xf32> to vector<1x2x1x8x8xf32>
    tpu.vector_store %arg5[%c0_8, %c0_9, %c1, %c0_10, %c0_11], %18 {strides = array<i32>} : memref<4x2x4x8x8xf32, #tpu.memory_space<vmem>>, vector<1x2x1x8x8xf32>,
    %19 = vector.extract_strided_slice %4 {offsets = [0, 16], sizes = [8, 8], strides = [1, 1]} : vector<8x128xf32> to vector<8x8xf32>
    %20 = vector.shape_cast %19 : vector<8x8xf32> to vector<1x8x8xf32>
    %21 = vector.shape_cast %20 : vector<1x8x8xf32> to vector<1x8x8xf32>
    %22 = vector.broadcast %21 : vector<1x8x8xf32> to vector<2x8x8xf32>
    %c0_12 = arith.constant 0 : index
    %c0_13 = arith.constant 0 : index
    %c2 = arith.constant 2 : index
    %c0_14 = arith.constant 0 : index
    %c0_15 = arith.constant 0 : index
    %23 = vector.load %arg5[%c0_12, %c0_13, %c2, %c0_14, %c0_15] : memref<4x2x4x8x8xf32, #tpu.memory_space<vmem>>, vector<1x2x1x8x8xf32>
    %24 = vector.shape_cast %23 : vector<1x2x1x8x8xf32> to vector<2x8x8xf32>
    %25 = vector.shape_cast %22 : vector<2x8x8xf32> to vector<1x2x1x8x8xf32>
    tpu.vector_store %arg5[%c0_12, %c0_13, %c2, %c0_14, %c0_15], %25 {strides = array<i32>} : memref<4x2x4x8x8xf32, #tpu.memory_space<vmem>>, vector<1x2x1x8x8xf32>,
    %26 = vector.extract_strided_slice %4 {offsets = [0, 24], sizes = [8, 8], strides = [1, 1]} : vector<8x128xf32> to vector<8x8xf32>
    %27 = vector.shape_cast %26 : vector<8x8xf32> to vector<1x8x8xf32>
    %28 = vector.shape_cast %27 : vector<1x8x8xf32> to vector<1x8x8xf32>
    %29 = vector.broadcast %28 : vector<1x8x8xf32> to vector<2x8x8xf32>
    %c0_16 = arith.constant 0 : index
    %c0_17 = arith.constant 0 : index
    %c3 = arith.constant 3 : index
    %c0_18 = arith.constant 0 : index
    %c0_19 = arith.constant 0 : index
    %30 = vector.load %arg5[%c0_16, %c0_17, %c3, %c0_18, %c0_19] : memref<4x2x4x8x8xf32, #tpu.memory_space<vmem>>, vector<1x2x1x8x8xf32>
    %31 = vector.shape_cast %30 : vector<1x2x1x8x8xf32> to vector<2x8x8xf32>
    %32 = vector.shape_cast %29 : vector<2x8x8xf32> to vector<1x2x1x8x8xf32>
    tpu.vector_store %arg5[%c0_16, %c0_17, %c3, %c0_18, %c0_19], %32 {strides = array<i32>} : memref<4x2x4x8x8xf32, #tpu.memory_space<vmem>>, vector<1x2x1x8x8xf32>,
    %33 = vector.extract_strided_slice %4 {offsets = [0, 32], sizes = [8, 8], strides = [1, 1]} : vector<8x128xf32> to vector<8x8xf32>
    %34 = vector.shape_cast %33 : vector<8x8xf32> to vector<1x8x8xf32>
    %35 = vector.shape_cast %34 : vector<1x8x8xf32> to vector<1x8x8xf32>
    %36 = vector.broadcast %35 : vector<1x8x8xf32> to vector<2x8x8xf32>
    %c1_20 = arith.constant 1 : index
    %c0_21 = arith.constant 0 : index
    %c0_22 = arith.constant 0 : index
    %c0_23 = arith.constant 0 : index
    %c0_24 = arith.constant 0 : index
    %37 = vector.load %arg5[%c1_20, %c0_21, %c0_22, %c0_23, %c0_24] : memref<4x2x4x8x8xf32, #tpu.memory_space<vmem>>, vector<1x2x1x8x8xf32>
    %38 = vector.shape_cast %37 : vector<1x2x1x8x8xf32> to vector<2x8x8xf32>
    %39 = vector.shape_cast %36 : vector<2x8x8xf32> to vector<1x2x1x8x8xf32>
    tpu.vector_store %arg5[%c1_20, %c0_21, %c0_22, %c0_23, %c0_24], %39 {strides = array<i32>} : memref<4x2x4x8x8xf32, #tpu.memory_space<vmem>>, vector<1x2x1x8x8xf32>,
    %40 = vector.extract_strided_slice %4 {offsets = [0, 40], sizes = [8, 8], strides = [1, 1]} : vector<8x128xf32> to vector<8x8xf32>
    %41 = vector.shape_cast %40 : vector<8x8xf32> to vector<1x8x8xf32>
    %42 = vector.shape_cast %41 : vector<1x8x8xf32> to vector<1x8x8xf32>
    %43 = vector.broadcast %42 : vector<1x8x8xf32> to vector<2x8x8xf32>
    %c1_25 = arith.constant 1 : index
    %c0_26 = arith.constant 0 : index
    %c1_27 = arith.constant 1 : index
    %c0_28 = arith.constant 0 : index
    %c0_29 = arith.constant 0 : index
    %44 = vector.load %arg5[%c1_25, %c0_26, %c1_27, %c0_28, %c0_29] : memref<4x2x4x8x8xf32, #tpu.memory_space<vmem>>, vector<1x2x1x8x8xf32>
    %45 = vector.shape_cast %44 : vector<1x2x1x8x8xf32> to vector<2x8x8xf32>
    %46 = vector.shape_cast %43 : vector<2x8x8xf32> to vector<1x2x1x8x8xf32>
    tpu.vector_store %arg5[%c1_25, %c0_26, %c1_27, %c0_28, %c0_29], %46 {strides = array<i32>} : memref<4x2x4x8x8xf32, #tpu.memory_space<vmem>>, vector<1x2x1x8x8xf32>,
    %47 = vector.extract_strided_slice %4 {offsets = [0, 48], sizes = [8, 8], strides = [1, 1]} : vector<8x128xf32> to vector<8x8xf32>
    %48 = vector.shape_cast %47 : vector<8x8xf32> to vector<1x8x8xf32>
    %49 = vector.shape_cast %48 : vector<1x8x8xf32> to vector<1x8x8xf32>
    %50 = vector.broadcast %49 : vector<1x8x8xf32> to vector<2x8x8xf32>
    %c1_30 = arith.constant 1 : index
    %c0_31 = arith.constant 0 : index
    %c2_32 = arith.constant 2 : index
    %c0_33 = arith.constant 0 : index
    %c0_34 = arith.constant 0 : index
    %51 = vector.load %arg5[%c1_30, %c0_31, %c2_32, %c0_33, %c0_34] : memref<4x2x4x8x8xf32, #tpu.memory_space<vmem>>, vector<1x2x1x8x8xf32>
    %52 = vector.shape_cast %51 : vector<1x2x1x8x8xf32> to vector<2x8x8xf32>
    %53 = vector.shape_cast %50 : vector<2x8x8xf32> to vector<1x2x1x8x8xf32>
    tpu.vector_store %arg5[%c1_30, %c0_31, %c2_32, %c0_33, %c0_34], %53 {strides = array<i32>} : memref<4x2x4x8x8xf32, #tpu.memory_space<vmem>>, vector<1x2x1x8x8xf32>,
    %54 = vector.extract_strided_slice %4 {offsets = [0, 56], sizes = [8, 8], strides = [1, 1]} : vector<8x128xf32> to vector<8x8xf32>
    %55 = vector.shape_cast %54 : vector<8x8xf32> to vector<1x8x8xf32>
    %56 = vector.shape_cast %55 : vector<1x8x8xf32> to vector<1x8x8xf32>
    %57 = vector.broadcast %56 : vector<1x8x8xf32> to vector<2x8x8xf32>
    %c1_35 = arith.constant 1 : index
    %c0_36 = arith.constant 0 : index
    %c3_37 = arith.constant 3 : index
    %c0_38 = arith.constant 0 : index
    %c0_39 = arith.constant 0 : index
    %58 = vector.load %arg5[%c1_35, %c0_36, %c3_37, %c0_38, %c0_39] : memref<4x2x4x8x8xf32, #tpu.memory_space<vmem>>, vector<1x2x1x8x8xf32>
    %59 = vector.shape_cast %58 : vector<1x2x1x8x8xf32> to vector<2x8x8xf32>
    %60 = vector.shape_cast %57 : vector<2x8x8xf32> to vector<1x2x1x8x8xf32>
    tpu.vector_store %arg5[%c1_35, %c0_36, %c3_37, %c0_38, %c0_39], %60 {strides = array<i32>} : memref<4x2x4x8x8xf32, #tpu.memory_space<vmem>>, vector<1x2x1x8x8xf32>,
    %61 = vector.extract_strided_slice %4 {offsets = [0, 64], sizes = [8, 8], strides = [1, 1]} : vector<8x128xf32> to vector<8x8xf32>
    %62 = vector.shape_cast %61 : vector<8x8xf32> to vector<1x8x8xf32>
    %63 = vector.shape_cast %62 : vector<1x8x8xf32> to vector<1x8x8xf32>
    %64 = vector.broadcast %63 : vector<1x8x8xf32> to vector<2x8x8xf32>
    %c2_40 = arith.constant 2 : index
    %c0_41 = arith.constant 0 : index
    %c0_42 = arith.constant 0 : index
    %c0_43 = arith.constant 0 : index
    %c0_44 = arith.constant 0 : index
    %65 = vector.load %arg5[%c2_40, %c0_41, %c0_42, %c0_43, %c0_44] : memref<4x2x4x8x8xf32, #tpu.memory_space<vmem>>, vector<1x2x1x8x8xf32>
    %66 = vector.shape_cast %65 : vector<1x2x1x8x8xf32> to vector<2x8x8xf32>
    %67 = vector.shape_cast %64 : vector<2x8x8xf32> to vector<1x2x1x8x8xf32>
    tpu.vector_store %arg5[%c2_40, %c0_41, %c0_42, %c0_43, %c0_44], %67 {strides = array<i32>} : memref<4x2x4x8x8xf32, #tpu.memory_space<vmem>>, vector<1x2x1x8x8xf32>,
    %68 = vector.extract_strided_slice %4 {offsets = [0, 72], sizes = [8, 8], strides = [1, 1]} : vector<8x128xf32> to vector<8x8xf32>
    %69 = vector.shape_cast %68 : vector<8x8xf32> to vector<1x8x8xf32>
    %70 = vector.shape_cast %69 : vector<1x8x8xf32> to vector<1x8x8xf32>
    %71 = vector.broadcast %70 : vector<1x8x8xf32> to vector<2x8x8xf32>
    %c2_45 = arith.constant 2 : index
    %c0_46 = arith.constant 0 : index
    %c1_47 = arith.constant 1 : index
    %c0_48 = arith.constant 0 : index
    %c0_49 = arith.constant 0 : index
    %72 = vector.load %arg5[%c2_45, %c0_46, %c1_47, %c0_48, %c0_49] : memref<4x2x4x8x8xf32, #tpu.memory_space<vmem>>, vector<1x2x1x8x8xf32>
    %73 = vector.shape_cast %72 : vector<1x2x1x8x8xf32> to vector<2x8x8xf32>
    %74 = vector.shape_cast %71 : vector<2x8x8xf32> to vector<1x2x1x8x8xf32>
    tpu.vector_store %arg5[%c2_45, %c0_46, %c1_47, %c0_48, %c0_49], %74 {strides = array<i32>} : memref<4x2x4x8x8xf32, #tpu.memory_space<vmem>>, vector<1x2x1x8x8xf32>,
    %75 = vector.extract_strided_slice %4 {offsets = [0, 80], sizes = [8, 8], strides = [1, 1]} : vector<8x128xf32> to vector<8x8xf32>
    %76 = vector.shape_cast %75 : vector<8x8xf32> to vector<1x8x8xf32>
    %77 = vector.shape_cast %76 : vector<1x8x8xf32> to vector<1x8x8xf32>
    %78 = vector.broadcast %77 : vector<1x8x8xf32> to vector<2x8x8xf32>
    %c2_50 = arith.constant 2 : index
    %c0_51 = arith.constant 0 : index
    %c2_52 = arith.constant 2 : index
    %c0_53 = arith.constant 0 : index
    %c0_54 = arith.constant 0 : index
    %79 = vector.load %arg5[%c2_50, %c0_51, %c2_52, %c0_53, %c0_54] : memref<4x2x4x8x8xf32, #tpu.memory_space<vmem>>, vector<1x2x1x8x8xf32>
    %80 = vector.shape_cast %79 : vector<1x2x1x8x8xf32> to vector<2x8x8xf32>
    %81 = vector.shape_cast %78 : vector<2x8x8xf32> to vector<1x2x1x8x8xf32>
    tpu.vector_store %arg5[%c2_50, %c0_51, %c2_52, %c0_53, %c0_54], %81 {strides = array<i32>} : memref<4x2x4x8x8xf32, #tpu.memory_space<vmem>>, vector<1x2x1x8x8xf32>,
    %82 = vector.extract_strided_slice %4 {offsets = [0, 88], sizes = [8, 8], strides = [1, 1]} : vector<8x128xf32> to vector<8x8xf32>
    %83 = vector.shape_cast %82 : vector<8x8xf32> to vector<1x8x8xf32>
    %84 = vector.shape_cast %83 : vector<1x8x8xf32> to vector<1x8x8xf32>
    %85 = vector.broadcast %84 : vector<1x8x8xf32> to vector<2x8x8xf32>
    %c2_55 = arith.constant 2 : index
    %c0_56 = arith.constant 0 : index
    %c3_57 = arith.constant 3 : index
    %c0_58 = arith.constant 0 : index
    %c0_59 = arith.constant 0 : index
    %86 = vector.load %arg5[%c2_55, %c0_56, %c3_57, %c0_58, %c0_59] : memref<4x2x4x8x8xf32, #tpu.memory_space<vmem>>, vector<1x2x1x8x8xf32>
    %87 = vector.shape_cast %86 : vector<1x2x1x8x8xf32> to vector<2x8x8xf32>
    %88 = vector.shape_cast %85 : vector<2x8x8xf32> to vector<1x2x1x8x8xf32>
    tpu.vector_store %arg5[%c2_55, %c0_56, %c3_57, %c0_58, %c0_59], %88 {strides = array<i32>} : memref<4x2x4x8x8xf32, #tpu.memory_space<vmem>>, vector<1x2x1x8x8xf32>,
    %89 = vector.extract_strided_slice %4 {offsets = [0, 96], sizes = [8, 8], strides = [1, 1]} : vector<8x128xf32> to vector<8x8xf32>
    %90 = vector.shape_cast %89 : vector<8x8xf32> to vector<1x8x8xf32>
    %91 = vector.shape_cast %90 : vector<1x8x8xf32> to vector<1x8x8xf32>
    %92 = vector.broadcast %91 : vector<1x8x8xf32> to vector<2x8x8xf32>
    %c3_60 = arith.constant 3 : index
    %c0_61 = arith.constant 0 : index
    %c0_62 = arith.constant 0 : index
    %c0_63 = arith.constant 0 : index
    %c0_64 = arith.constant 0 : index
    %93 = vector.load %arg5[%c3_60, %c0_61, %c0_62, %c0_63, %c0_64] : memref<4x2x4x8x8xf32, #tpu.memory_space<vmem>>, vector<1x2x1x8x8xf32>
    %94 = vector.shape_cast %93 : vector<1x2x1x8x8xf32> to vector<2x8x8xf32>
    %95 = vector.shape_cast %92 : vector<2x8x8xf32> to vector<1x2x1x8x8xf32>
    tpu.vector_store %arg5[%c3_60, %c0_61, %c0_62, %c0_63, %c0_64], %95 {strides = array<i32>} : memref<4x2x4x8x8xf32, #tpu.memory_space<vmem>>, vector<1x2x1x8x8xf32>,
    %96 = vector.extract_strided_slice %4 {offsets = [0, 104], sizes = [8, 8], strides = [1, 1]} : vector<8x128xf32> to vector<8x8xf32>
    %97 = vector.shape_cast %96 : vector<8x8xf32> to vector<1x8x8xf32>
    %98 = vector.shape_cast %97 : vector<1x8x8xf32> to vector<1x8x8xf32>
    %99 = vector.broadcast %98 : vector<1x8x8xf32> to vector<2x8x8xf32>
    %c3_65 = arith.constant 3 : index
    %c0_66 = arith.constant 0 : index
    %c1_67 = arith.constant 1 : index
    %c0_68 = arith.constant 0 : index
    %c0_69 = arith.constant 0 : index
    %100 = vector.load %arg5[%c3_65, %c0_66, %c1_67, %c0_68, %c0_69] : memref<4x2x4x8x8xf32, #tpu.memory_space<vmem>>, vector<1x2x1x8x8xf32>
    %101 = vector.shape_cast %100 : vector<1x2x1x8x8xf32> to vector<2x8x8xf32>
    %102 = vector.shape_cast %99 : vector<2x8x8xf32> to vector<1x2x1x8x8xf32>
    tpu.vector_store %arg5[%c3_65, %c0_66, %c1_67, %c0_68, %c0_69], %102 {strides = array<i32>} : memref<4x2x4x8x8xf32, #tpu.memory_space<vmem>>, vector<1x2x1x8x8xf32>,
    %103 = vector.extract_strided_slice %4 {offsets = [0, 112], sizes = [8, 8], strides = [1, 1]} : vector<8x128xf32> to vector<8x8xf32>
    %104 = vector.shape_cast %103 : vector<8x8xf32> to vector<1x8x8xf32>
    %105 = vector.shape_cast %104 : vector<1x8x8xf32> to vector<1x8x8xf32>
    %106 = vector.broadcast %105 : vector<1x8x8xf32> to vector<2x8x8xf32>
    %c3_70 = arith.constant 3 : index
    %c0_71 = arith.constant 0 : index
    %c2_72 = arith.constant 2 : index
    %c0_73 = arith.constant 0 : index
    %c0_74 = arith.constant 0 : index
    %107 = vector.load %arg5[%c3_70, %c0_71, %c2_72, %c0_73, %c0_74] : memref<4x2x4x8x8xf32, #tpu.memory_space<vmem>>, vector<1x2x1x8x8xf32>
    %108 = vector.shape_cast %107 : vector<1x2x1x8x8xf32> to vector<2x8x8xf32>
    %109 = vector.shape_cast %106 : vector<2x8x8xf32> to vector<1x2x1x8x8xf32>
    tpu.vector_store %arg5[%c3_70, %c0_71, %c2_72, %c0_73, %c0_74], %109 {strides = array<i32>} : memref<4x2x4x8x8xf32, #tpu.memory_space<vmem>>, vector<1x2x1x8x8xf32>,
    %110 = vector.extract_strided_slice %4 {offsets = [0, 120], sizes = [8, 8], strides = [1, 1]} : vector<8x128xf32> to vector<8x8xf32>
    %111 = vector.shape_cast %110 : vector<8x8xf32> to vector<1x8x8xf32>
    %112 = vector.shape_cast %111 : vector<1x8x8xf32> to vector<1x8x8xf32>
    %113 = vector.broadcast %112 : vector<1x8x8xf32> to vector<2x8x8xf32>
    %c3_75 = arith.constant 3 : index
    %c0_76 = arith.constant 0 : index
    %c3_77 = arith.constant 3 : index
    %c0_78 = arith.constant 0 : index
    %c0_79 = arith.constant 0 : index
    %114 = vector.load %arg5[%c3_75, %c0_76, %c3_77, %c0_78, %c0_79] : memref<4x2x4x8x8xf32, #tpu.memory_space<vmem>>, vector<1x2x1x8x8xf32>
    %115 = vector.shape_cast %114 : vector<1x2x1x8x8xf32> to vector<2x8x8xf32>
    %116 = vector.shape_cast %113 : vector<2x8x8xf32> to vector<1x2x1x8x8xf32>
    tpu.vector_store %arg5[%c3_75, %c0_76, %c3_77, %c0_78, %c0_79], %116 {strides = array<i32>} : memref<4x2x4x8x8xf32, #tpu.memory_space<vmem>>, vector<1x2x1x8x8xf32>,
    %117 = vector.extract_strided_slice %0 {offsets = [0, 0], sizes = [8, 8], strides = [1, 1]} : vector<8x128xf32> to vector<8x8xf32>
    %118 = vector.shape_cast %117 : vector<8x8xf32> to vector<1x8x8xf32>
    %119 = vector.shape_cast %118 : vector<1x8x8xf32> to vector<1x8x8xf32>
    %120 = vector.broadcast %119 : vector<1x8x8xf32> to vector<2x8x8xf32>
    %c0_80 = arith.constant 0 : index
    %c0_81 = arith.constant 0 : index
    %c0_82 = arith.constant 0 : index
    %c0_83 = arith.constant 0 : index
    %c0_84 = arith.constant 0 : index
    %121 = vector.load %arg6[%c0_80, %c0_81, %c0_82, %c0_83, %c0_84] : memref<4x2x4x8x8xf32, #tpu.memory_space<vmem>>, vector<1x2x1x8x8xf32>
    %122 = vector.shape_cast %121 : vector<1x2x1x8x8xf32> to vector<2x8x8xf32>
    %123 = vector.shape_cast %120 : vector<2x8x8xf32> to vector<1x2x1x8x8xf32>
    tpu.vector_store %arg6[%c0_80, %c0_81, %c0_82, %c0_83, %c0_84], %123 {strides = array<i32>} : memref<4x2x4x8x8xf32, #tpu.memory_space<vmem>>, vector<1x2x1x8x8xf32>,
    %124 = vector.extract_strided_slice %0 {offsets = [0, 8], sizes = [8, 8], strides = [1, 1]} : vector<8x128xf32> to vector<8x8xf32>
    %125 = vector.shape_cast %124 : vector<8x8xf32> to vector<1x8x8xf32>
    %126 = vector.shape_cast %125 : vector<1x8x8xf32> to vector<1x8x8xf32>
    %127 = vector.broadcast %126 : vector<1x8x8xf32> to vector<2x8x8xf32>
    %c0_85 = arith.constant 0 : index
    %c0_86 = arith.constant 0 : index
    %c1_87 = arith.constant 1 : index
    %c0_88 = arith.constant 0 : index
    %c0_89 = arith.constant 0 : index
    %128 = vector.load %arg6[%c0_85, %c0_86, %c1_87, %c0_88, %c0_89] : memref<4x2x4x8x8xf32, #tpu.memory_space<vmem>>, vector<1x2x1x8x8xf32>
    %129 = vector.shape_cast %128 : vector<1x2x1x8x8xf32> to vector<2x8x8xf32>
    %130 = vector.shape_cast %127 : vector<2x8x8xf32> to vector<1x2x1x8x8xf32>
    tpu.vector_store %arg6[%c0_85, %c0_86, %c1_87, %c0_88, %c0_89], %130 {strides = array<i32>} : memref<4x2x4x8x8xf32, #tpu.memory_space<vmem>>, vector<1x2x1x8x8xf32>,
    %131 = vector.extract_strided_slice %0 {offsets = [0, 16], sizes = [8, 8], strides = [1, 1]} : vector<8x128xf32> to vector<8x8xf32>
    %132 = vector.shape_cast %131 : vector<8x8xf32> to vector<1x8x8xf32>
    %133 = vector.shape_cast %132 : vector<1x8x8xf32> to vector<1x8x8xf32>
    %134 = vector.broadcast %133 : vector<1x8x8xf32> to vector<2x8x8xf32>
    %c0_90 = arith.constant 0 : index
    %c0_91 = arith.constant 0 : index
    %c2_92 = arith.constant 2 : index
    %c0_93 = arith.constant 0 : index
    %c0_94 = arith.constant 0 : index
    %135 = vector.load %arg6[%c0_90, %c0_91, %c2_92, %c0_93, %c0_94] : memref<4x2x4x8x8xf32, #tpu.memory_space<vmem>>, vector<1x2x1x8x8xf32>
    %136 = vector.shape_cast %135 : vector<1x2x1x8x8xf32> to vector<2x8x8xf32>
    %137 = vector.shape_cast %134 : vector<2x8x8xf32> to vector<1x2x1x8x8xf32>
    tpu.vector_store %arg6[%c0_90, %c0_91, %c2_92, %c0_93, %c0_94], %137 {strides = array<i32>} : memref<4x2x4x8x8xf32, #tpu.memory_space<vmem>>, vector<1x2x1x8x8xf32>,
    %138 = vector.extract_strided_slice %0 {offsets = [0, 24], sizes = [8, 8], strides = [1, 1]} : vector<8x128xf32> to vector<8x8xf32>
    %139 = vector.shape_cast %138 : vector<8x8xf32> to vector<1x8x8xf32>
    %140 = vector.shape_cast %139 : vector<1x8x8xf32> to vector<1x8x8xf32>
    %141 = vector.broadcast %140 : vector<1x8x8xf32> to vector<2x8x8xf32>
    %c0_95 = arith.constant 0 : index
    %c0_96 = arith.constant 0 : index
    %c3_97 = arith.constant 3 : index
    %c0_98 = arith.constant 0 : index
    %c0_99 = arith.constant 0 : index
    %142 = vector.load %arg6[%c0_95, %c0_96, %c3_97, %c0_98, %c0_99] : memref<4x2x4x8x8xf32, #tpu.memory_space<vmem>>, vector<1x2x1x8x8xf32>
    %143 = vector.shape_cast %142 : vector<1x2x1x8x8xf32> to vector<2x8x8xf32>
    %144 = vector.shape_cast %141 : vector<2x8x8xf32> to vector<1x2x1x8x8xf32>
    tpu.vector_store %arg6[%c0_95, %c0_96, %c3_97, %c0_98, %c0_99], %144 {strides = array<i32>} : memref<4x2x4x8x8xf32, #tpu.memory_space<vmem>>, vector<1x2x1x8x8xf32>,
    %145 = vector.extract_strided_slice %0 {offsets = [0, 32], sizes = [8, 8], strides = [1, 1]} : vector<8x128xf32> to vector<8x8xf32>
    %146 = vector.shape_cast %145 : vector<8x8xf32> to vector<1x8x8xf32>
    %147 = vector.shape_cast %146 : vector<1x8x8xf32> to vector<1x8x8xf32>
    %148 = vector.broadcast %147 : vector<1x8x8xf32> to vector<2x8x8xf32>
    %c1_100 = arith.constant 1 : index
    %c0_101 = arith.constant 0 : index
    %c0_102 = arith.constant 0 : index
    %c0_103 = arith.constant 0 : index
    %c0_104 = arith.constant 0 : index
    %149 = vector.load %arg6[%c1_100, %c0_101, %c0_102, %c0_103, %c0_104] : memref<4x2x4x8x8xf32, #tpu.memory_space<vmem>>, vector<1x2x1x8x8xf32>
    %150 = vector.shape_cast %149 : vector<1x2x1x8x8xf32> to vector<2x8x8xf32>
    %151 = vector.shape_cast %148 : vector<2x8x8xf32> to vector<1x2x1x8x8xf32>
    tpu.vector_store %arg6[%c1_100, %c0_101, %c0_102, %c0_103, %c0_104], %151 {strides = array<i32>} : memref<4x2x4x8x8xf32, #tpu.memory_space<vmem>>, vector<1x2x1x8x8xf32>,
    %152 = vector.extract_strided_slice %0 {offsets = [0, 40], sizes = [8, 8], strides = [1, 1]} : vector<8x128xf32> to vector<8x8xf32>
    %153 = vector.shape_cast %152 : vector<8x8xf32> to vector<1x8x8xf32>
    %154 = vector.shape_cast %153 : vector<1x8x8xf32> to vector<1x8x8xf32>
    %155 = vector.broadcast %154 : vector<1x8x8xf32> to vector<2x8x8xf32>
    %c1_105 = arith.constant 1 : index
    %c0_106 = arith.constant 0 : index
    %c1_107 = arith.constant 1 : index
    %c0_108 = arith.constant 0 : index
    %c0_109 = arith.constant 0 : index
    %156 = vector.load %arg6[%c1_105, %c0_106, %c1_107, %c0_108, %c0_109] : memref<4x2x4x8x8xf32, #tpu.memory_space<vmem>>, vector<1x2x1x8x8xf32>
    %157 = vector.shape_cast %156 : vector<1x2x1x8x8xf32> to vector<2x8x8xf32>
    %158 = vector.shape_cast %155 : vector<2x8x8xf32> to vector<1x2x1x8x8xf32>
    tpu.vector_store %arg6[%c1_105, %c0_106, %c1_107, %c0_108, %c0_109], %158 {strides = array<i32>} : memref<4x2x4x8x8xf32, #tpu.memory_space<vmem>>, vector<1x2x1x8x8xf32>,
    %159 = vector.extract_strided_slice %0 {offsets = [0, 48], sizes = [8, 8], strides = [1, 1]} : vector<8x128xf32> to vector<8x8xf32>
    %160 = vector.shape_cast %159 : vector<8x8xf32> to vector<1x8x8xf32>
    %161 = vector.shape_cast %160 : vector<1x8x8xf32> to vector<1x8x8xf32>
    %162 = vector.broadcast %161 : vector<1x8x8xf32> to vector<2x8x8xf32>
    %c1_110 = arith.constant 1 : index
    %c0_111 = arith.constant 0 : index
    %c2_112 = arith.constant 2 : index
    %c0_113 = arith.constant 0 : index
    %c0_114 = arith.constant 0 : index
    %163 = vector.load %arg6[%c1_110, %c0_111, %c2_112, %c0_113, %c0_114] : memref<4x2x4x8x8xf32, #tpu.memory_space<vmem>>, vector<1x2x1x8x8xf32>
    %164 = vector.shape_cast %163 : vector<1x2x1x8x8xf32> to vector<2x8x8xf32>
    %165 = vector.shape_cast %162 : vector<2x8x8xf32> to vector<1x2x1x8x8xf32>
    tpu.vector_store %arg6[%c1_110, %c0_111, %c2_112, %c0_113, %c0_114], %165 {strides = array<i32>} : memref<4x2x4x8x8xf32, #tpu.memory_space<vmem>>, vector<1x2x1x8x8xf32>,
    %166 = vector.extract_strided_slice %0 {offsets = [0, 56], sizes = [8, 8], strides = [1, 1]} : vector<8x128xf32> to vector<8x8xf32>
    %167 = vector.shape_cast %166 : vector<8x8xf32> to vector<1x8x8xf32>
    %168 = vector.shape_cast %167 : vector<1x8x8xf32> to vector<1x8x8xf32>
    %169 = vector.broadcast %168 : vector<1x8x8xf32> to vector<2x8x8xf32>
    %c1_115 = arith.constant 1 : index
    %c0_116 = arith.constant 0 : index
    %c3_117 = arith.constant 3 : index
    %c0_118 = arith.constant 0 : index
    %c0_119 = arith.constant 0 : index
    %170 = vector.load %arg6[%c1_115, %c0_116, %c3_117, %c0_118, %c0_119] : memref<4x2x4x8x8xf32, #tpu.memory_space<vmem>>, vector<1x2x1x8x8xf32>
    %171 = vector.shape_cast %170 : vector<1x2x1x8x8xf32> to vector<2x8x8xf32>
    %172 = vector.shape_cast %169 : vector<2x8x8xf32> to vector<1x2x1x8x8xf32>
    tpu.vector_store %arg6[%c1_115, %c0_116, %c3_117, %c0_118, %c0_119], %172 {strides = array<i32>} : memref<4x2x4x8x8xf32, #tpu.memory_space<vmem>>, vector<1x2x1x8x8xf32>,
    %173 = vector.extract_strided_slice %0 {offsets = [0, 64], sizes = [8, 8], strides = [1, 1]} : vector<8x128xf32> to vector<8x8xf32>
    %174 = vector.shape_cast %173 : vector<8x8xf32> to vector<1x8x8xf32>
    %175 = vector.shape_cast %174 : vector<1x8x8xf32> to vector<1x8x8xf32>
    %176 = vector.broadcast %175 : vector<1x8x8xf32> to vector<2x8x8xf32>
    %c2_120 = arith.constant 2 : index
    %c0_121 = arith.constant 0 : index
    %c0_122 = arith.constant 0 : index
    %c0_123 = arith.constant 0 : index
    %c0_124 = arith.constant 0 : index
    %177 = vector.load %arg6[%c2_120, %c0_121, %c0_122, %c0_123, %c0_124] : memref<4x2x4x8x8xf32, #tpu.memory_space<vmem>>, vector<1x2x1x8x8xf32>
    %178 = vector.shape_cast %177 : vector<1x2x1x8x8xf32> to vector<2x8x8xf32>
    %179 = vector.shape_cast %176 : vector<2x8x8xf32> to vector<1x2x1x8x8xf32>
    tpu.vector_store %arg6[%c2_120, %c0_121, %c0_122, %c0_123, %c0_124], %179 {strides = array<i32>} : memref<4x2x4x8x8xf32, #tpu.memory_space<vmem>>, vector<1x2x1x8x8xf32>,
    %180 = vector.extract_strided_slice %0 {offsets = [0, 72], sizes = [8, 8], strides = [1, 1]} : vector<8x128xf32> to vector<8x8xf32>
    %181 = vector.shape_cast %180 : vector<8x8xf32> to vector<1x8x8xf32>
    %182 = vector.shape_cast %181 : vector<1x8x8xf32> to vector<1x8x8xf32>
    %183 = vector.broadcast %182 : vector<1x8x8xf32> to vector<2x8x8xf32>
    %c2_125 = arith.constant 2 : index
    %c0_126 = arith.constant 0 : index
    %c1_127 = arith.constant 1 : index
    %c0_128 = arith.constant 0 : index
    %c0_129 = arith.constant 0 : index
    %184 = vector.load %arg6[%c2_125, %c0_126, %c1_127, %c0_128, %c0_129] : memref<4x2x4x8x8xf32, #tpu.memory_space<vmem>>, vector<1x2x1x8x8xf32>
    %185 = vector.shape_cast %184 : vector<1x2x1x8x8xf32> to vector<2x8x8xf32>
    %186 = vector.shape_cast %183 : vector<2x8x8xf32> to vector<1x2x1x8x8xf32>
    tpu.vector_store %arg6[%c2_125, %c0_126, %c1_127, %c0_128, %c0_129], %186 {strides = array<i32>} : memref<4x2x4x8x8xf32, #tpu.memory_space<vmem>>, vector<1x2x1x8x8xf32>,
    %187 = vector.extract_strided_slice %0 {offsets = [0, 80], sizes = [8, 8], strides = [1, 1]} : vector<8x128xf32> to vector<8x8xf32>
    %188 = vector.shape_cast %187 : vector<8x8xf32> to vector<1x8x8xf32>
    %189 = vector.shape_cast %188 : vector<1x8x8xf32> to vector<1x8x8xf32>
    %190 = vector.broadcast %189 : vector<1x8x8xf32> to vector<2x8x8xf32>
    %c2_130 = arith.constant 2 : index
    %c0_131 = arith.constant 0 : index
    %c2_132 = arith.constant 2 : index
    %c0_133 = arith.constant 0 : index
    %c0_134 = arith.constant 0 : index
    %191 = vector.load %arg6[%c2_130, %c0_131, %c2_132, %c0_133, %c0_134] : memref<4x2x4x8x8xf32, #tpu.memory_space<vmem>>, vector<1x2x1x8x8xf32>
    %192 = vector.shape_cast %191 : vector<1x2x1x8x8xf32> to vector<2x8x8xf32>
    %193 = vector.shape_cast %190 : vector<2x8x8xf32> to vector<1x2x1x8x8xf32>
    tpu.vector_store %arg6[%c2_130, %c0_131, %c2_132, %c0_133, %c0_134], %193 {strides = array<i32>} : memref<4x2x4x8x8xf32, #tpu.memory_space<vmem>>, vector<1x2x1x8x8xf32>,
    %194 = vector.extract_strided_slice %0 {offsets = [0, 88], sizes = [8, 8], strides = [1, 1]} : vector<8x128xf32> to vector<8x8xf32>
    %195 = vector.shape_cast %194 : vector<8x8xf32> to vector<1x8x8xf32>
    %196 = vector.shape_cast %195 : vector<1x8x8xf32> to vector<1x8x8xf32>
    %197 = vector.broadcast %196 : vector<1x8x8xf32> to vector<2x8x8xf32>
    %c2_135 = arith.constant 2 : index
    %c0_136 = arith.constant 0 : index
    %c3_137 = arith.constant 3 : index
    %c0_138 = arith.constant 0 : index
    %c0_139 = arith.constant 0 : index
    %198 = vector.load %arg6[%c2_135, %c0_136, %c3_137, %c0_138, %c0_139] : memref<4x2x4x8x8xf32, #tpu.memory_space<vmem>>, vector<1x2x1x8x8xf32>
    %199 = vector.shape_cast %198 : vector<1x2x1x8x8xf32> to vector<2x8x8xf32>
    %200 = vector.shape_cast %197 : vector<2x8x8xf32> to vector<1x2x1x8x8xf32>
    tpu.vector_store %arg6[%c2_135, %c0_136, %c3_137, %c0_138, %c0_139], %200 {strides = array<i32>} : memref<4x2x4x8x8xf32, #tpu.memory_space<vmem>>, vector<1x2x1x8x8xf32>,
    %201 = vector.extract_strided_slice %0 {offsets = [0, 96], sizes = [8, 8], strides = [1, 1]} : vector<8x128xf32> to vector<8x8xf32>
    %202 = vector.shape_cast %201 : vector<8x8xf32> to vector<1x8x8xf32>
    %203 = vector.shape_cast %202 : vector<1x8x8xf32> to vector<1x8x8xf32>
    %204 = vector.broadcast %203 : vector<1x8x8xf32> to vector<2x8x8xf32>
    %c3_140 = arith.constant 3 : index
    %c0_141 = arith.constant 0 : index
    %c0_142 = arith.constant 0 : index
    %c0_143 = arith.constant 0 : index
    %c0_144 = arith.constant 0 : index
    %205 = vector.load %arg6[%c3_140, %c0_141, %c0_142, %c0_143, %c0_144] : memref<4x2x4x8x8xf32, #tpu.memory_space<vmem>>, vector<1x2x1x8x8xf32>
    %206 = vector.shape_cast %205 : vector<1x2x1x8x8xf32> to vector<2x8x8xf32>
    %207 = vector.shape_cast %204 : vector<2x8x8xf32> to vector<1x2x1x8x8xf32>
    tpu.vector_store %arg6[%c3_140, %c0_141, %c0_142, %c0_143, %c0_144], %207 {strides = array<i32>} : memref<4x2x4x8x8xf32, #tpu.memory_space<vmem>>, vector<1x2x1x8x8xf32>,
    %208 = vector.extract_strided_slice %0 {offsets = [0, 104], sizes = [8, 8], strides = [1, 1]} : vector<8x128xf32> to vector<8x8xf32>
    %209 = vector.shape_cast %208 : vector<8x8xf32> to vector<1x8x8xf32>
    %210 = vector.shape_cast %209 : vector<1x8x8xf32> to vector<1x8x8xf32>
    %211 = vector.broadcast %210 : vector<1x8x8xf32> to vector<2x8x8xf32>
    %c3_145 = arith.constant 3 : index
    %c0_146 = arith.constant 0 : index
    %c1_147 = arith.constant 1 : index
    %c0_148 = arith.constant 0 : index
    %c0_149 = arith.constant 0 : index
    %212 = vector.load %arg6[%c3_145, %c0_146, %c1_147, %c0_148, %c0_149] : memref<4x2x4x8x8xf32, #tpu.memory_space<vmem>>, vector<1x2x1x8x8xf32>
    %213 = vector.shape_cast %212 : vector<1x2x1x8x8xf32> to vector<2x8x8xf32>
    %214 = vector.shape_cast %211 : vector<2x8x8xf32> to vector<1x2x1x8x8xf32>
    tpu.vector_store %arg6[%c3_145, %c0_146, %c1_147, %c0_148, %c0_149], %214 {strides = array<i32>} : memref<4x2x4x8x8xf32, #tpu.memory_space<vmem>>, vector<1x2x1x8x8xf32>,
    %215 = vector.extract_strided_slice %0 {offsets = [0, 112], sizes = [8, 8], strides = [1, 1]} : vector<8x128xf32> to vector<8x8xf32>
    %216 = vector.shape_cast %215 : vector<8x8xf32> to vector<1x8x8xf32>
    %217 = vector.shape_cast %216 : vector<1x8x8xf32> to vector<1x8x8xf32>
    %218 = vector.broadcast %217 : vector<1x8x8xf32> to vector<2x8x8xf32>
    %c3_150 = arith.constant 3 : index
    %c0_151 = arith.constant 0 : index
    %c2_152 = arith.constant 2 : index
    %c0_153 = arith.constant 0 : index
    %c0_154 = arith.constant 0 : index
    %219 = vector.load %arg6[%c3_150, %c0_151, %c2_152, %c0_153, %c0_154] : memref<4x2x4x8x8xf32, #tpu.memory_space<vmem>>, vector<1x2x1x8x8xf32>
    %220 = vector.shape_cast %219 : vector<1x2x1x8x8xf32> to vector<2x8x8xf32>
    %221 = vector.shape_cast %218 : vector<2x8x8xf32> to vector<1x2x1x8x8xf32>
    tpu.vector_store %arg6[%c3_150, %c0_151, %c2_152, %c0_153, %c0_154], %221 {strides = array<i32>} : memref<4x2x4x8x8xf32, #tpu.memory_space<vmem>>, vector<1x2x1x8x8xf32>,
    %222 = vector.extract_strided_slice %0 {offsets = [0, 120], sizes = [8, 8], strides = [1, 1]} : vector<8x128xf32> to vector<8x8xf32>
    %223 = vector.shape_cast %222 : vector<8x8xf32> to vector<1x8x8xf32>
    %224 = vector.shape_cast %223 : vector<1x8x8xf32> to vector<1x8x8xf32>
    %225 = vector.broadcast %224 : vector<1x8x8xf32> to vector<2x8x8xf32>
    %c3_155 = arith.constant 3 : index
    %c0_156 = arith.constant 0 : index
    %c3_157 = arith.constant 3 : index
    %c0_158 = arith.constant 0 : index
    %c0_159 = arith.constant 0 : index
    %226 = vector.load %arg6[%c3_155, %c0_156, %c3_157, %c0_158, %c0_159] : memref<4x2x4x8x8xf32, #tpu.memory_space<vmem>>, vector<1x2x1x8x8xf32>
    %227 = vector.shape_cast %226 : vector<1x2x1x8x8xf32> to vector<2x8x8xf32>
    %228 = vector.shape_cast %225 : vector<2x8x8xf32> to vector<1x2x1x8x8xf32>
    tpu.vector_store %arg6[%c3_155, %c0_156, %c3_157, %c0_158, %c0_159], %228 {strides = array<i32>} : memref<4x2x4x8x8xf32, #tpu.memory_space<vmem>>, vector<1x2x1x8x8xf32>,
    return
  }
  func.func @transform_0(%arg0: i32, %arg1: i32, %arg2: i32) -> (i32, i32) {
    %c0_i32 = arith.constant 0 : i32
    return %arg1, %arg0 : i32, i32
  }
  func.func @transform_1(%arg0: i32, %arg1: i32, %arg2: i32) -> (i32, i32) {
    %c0_i32 = arith.constant 0 : i32
    return %arg1, %arg0 : i32, i32
  }
  func.func @transform_2(%arg0: i32, %arg1: i32, %arg2: i32) -> (i32, i32, i32, i32, i32) {
    %c0_i32 = arith.constant 0 : i32
    %c0_i32_0 = arith.constant 0 : i32
    %c0_i32_1 = arith.constant 0 : i32
    return %arg0, %arg2, %c0_i32, %arg1, %c0_i32_0 : i32, i32, i32, i32, i32
  }
  func.func @transform_3(%arg0: i32, %arg1: i32, %arg2: i32) -> (i32, i32, i32, i32, i32) {
    %c0_i32 = arith.constant 0 : i32
    %c0_i32_0 = arith.constant 0 : i32
    %c0_i32_1 = arith.constant 0 : i32
    return %arg0, %arg2, %c0_i32, %arg1, %c0_i32_0 : i32, i32, i32, i32, i32
  }
}

</mosaic_0001>

<bundles_post_ra>
// kernel: tpu_custom_call.1
= control target key start
LH: loop header
LB: loop body
LE: loop exit
PB: predicated region body
PF: predicated region fallthrough
CT: control target
= control target key end

     0   :  { %9 = vsyncpa [#allocation3], 0  ;;  %s500_s0 = inlined_call_operand.hbm [shape: f32[8,128], index: 0, kind: input, shape index: {}]   ;;  %s501_s1 = inlined_call_operand.hbm [shape: f32[8,128], index: 1, kind: input, shape index: {}]   ;;  %s502_s2 = inlined_call_operand.hbm [shape: f32[4,2,4,8,8], index: 2, kind: output, shape index: {0}]   ;;  %s503_s3 = inlined_call_operand.hbm [shape: f32[4,2,4,8,8], index: 3, kind: output, shape index: {1}]  }
   0x1   :  { %10 = vsyncpa [#allocation6], 0 }
   0x2   :  { %11 = vsyncpa [#allocation4], 0 }
   0x3   :  { %12 = vsyncpa [#allocation9], 0  ;;  %s372_s12 = smov [#allocation2]   ;;  %s373_s14 = smov [#allocation5]  }
   0x4   :  { %s19_s13 = sshll.u32 %s372_s12, 4  ;;  %s29_s15 = sshll.u32 %s373_s14, 4  ;;  %s20_s13 = int_to_ptr.vmem [resolvable:$true] %s19_s13  ;;  %s30_s15 = int_to_ptr.vmem [resolvable:$true] %s29_s15 }
   0x5   :  { %s292_s16 = scalar_lea.vmem %s20_s13, 128  ;;  %p297_p1 = scmp.lt.s32.totalorder %s20_s13, %s20_s13 }
   0x6   :  { %p293_p0 = scmp.ne.s32.totalorder %s20_s13, %s292_s16  ;;  %p298_p2 = scmp.lt.s32.totalorder %s292_s16, %s292_s16 }
   0x8   :  { %p299_p3 = por %p298_p2, %p297_p1 }
   0xa   :  { %p300_p4 = pnand %p299_p3, %p293_p0 }
   0xc   :  { %303 = shalt.err (!%p300_p4)
}
   0xd   :  { %22 = dma.hbm_to_vmem [thread:$0]  %s500_s0, 128, %s20_s13, [#allocation3]  }
   0xe   :  { %s312_s19 = scalar_lea.vmem %s30_s15, 128  ;;  %p317_p6 = scmp.lt.s32.totalorder %s30_s15, %s30_s15 }
   0xf   :  { %p313_p5 = scmp.ne.s32.totalorder %s30_s15, %s312_s19  ;;  %p318_p7 = scmp.lt.s32.totalorder %s312_s19, %s312_s19 }
  0x11   :  { %p319_p8 = por %p318_p7, %p317_p6 }
  0x13   :  { %p320_p9 = pnand %p319_p8, %p313_p5 }
  0x15   :  { %323 = shalt.err (!%p320_p9)
}
  0x16   :  { %32 = dma.hbm_to_vmem [thread:$0]  %s501_s1, 128, %s30_s15, [#allocation6]  }
  0x17   :  { %364 = dma.done.wait [#allocation3], 128  }
  0x18   :  { %365 = vsyncadd [#allocation3], 4294967168 }
  0x19   :  { %366 = dma.done.wait [#allocation6], 128  }
  0x1a   :  { %367 = vsyncadd [#allocation6], 4294967168  ;;  %v39_v0 = vld [vmem:[#allocation2] sm:$0xff]  ;;  %v40_v1 = vld [vmem:[#allocation5] sm:$0xff]  ;;  %vm43_vm0 = vcmask 64512   ;;  %s374_s0 = smov 104  }
  0x1b   :  { %v41_v2 = vadd.f32 %v40_v1, %v39_v0  ;;  %137 = vst.msk [vmem:[#allocation8] sm:$0xff] %vm43_vm0, %v39_v0  ;;  %138 = vst.msk [vmem:[#allocation8 + $0x20] sm:$0xff] %vm43_vm0, %v39_v0  ;;  %s375_s1 = smov 120   ;;  %s376_s22 = smov 96  }
  0x1c   :  { %s377_s23 = smov 112   ;;  %s378_s24 = smov 80  }
  0x1d   :  { %v42_v3 = vmul.f32 0.5, %v41_v2  ;;  %s379_s25 = smov 88   ;;  %s380_s26 = smov 64  }
  0x1e   :  { %s381_s27 = smov 72   ;;  %s382_s28 = smov 48  }
  0x1f   :  { %59 = vrot.lane.b32.xlu1 %v42_v3, %s374_s0  ;;  %44 = vst.msk [vmem:[#allocation7] sm:$0xff] %vm43_vm0, %v42_v3  ;;  %45 = vst.msk [vmem:[#allocation7 + $0x20] sm:$0xff] %vm43_vm0, %v42_v3  ;;  %47 = vrot.lane.b32.xlu0 %v42_v3, %s375_s1  ;;  %s383_s29 = smov 56   ;;  %s384_s30 = smov 32  }
  0x20   :  { %s385_s4 = smov 40   ;;  %s386_s5 = smov 16  }
  0x21   :  { %s387_s6 = smov 24   ;;  %s388_s7 = smov 8  }
  0x22   :  { %s389_s8 = smov [#allocation7]  }
  0x23   :  { %65 = vrot.lane.b32.xlu1 %v42_v3, %s376_s22  ;;  %53 = vrot.lane.b32.xlu0 %v42_v3, %s377_s23  ;;  %s235_s9 = sshll.u32 %s389_s8, 4  ;;  %s236_s9 = int_to_ptr.vmem [resolvable:$true] %s235_s9 }
  0x24   :  { %s324_s10 = scalar_lea.vmem %s236_s9, 4096  ;;  %p329_p11 = scmp.lt.s32.totalorder %s236_s9, %s236_s9 }
  0x25   :  { %p325_p10 = scmp.ne.s32.totalorder %s236_s9, %s324_s10  ;;  %p330_p12 = scmp.lt.s32.totalorder %s324_s10, %s324_s10 }
  0x27   :  { %77 = vrot.lane.b32.xlu1 %v42_v3, %s378_s24  ;;  %71 = vrot.lane.b32.xlu0 %v42_v3, %s379_s25  ;;  %p331_p13 = por %p330_p12, %p329_p11 }
  0x29   :  { %p332_p0 = pnand %p331_p13, %p325_p10 }
  0x2b   :  { %89 = vrot.lane.b32.xlu1 %v42_v3, %s380_s26  ;;  %83 = vrot.lane.b32.xlu0 %v42_v3, %s381_s27 }
  0x2f   :  { %101 = vrot.lane.b32.xlu1 %v42_v3, %s382_s28  ;;  %95 = vrot.lane.b32.xlu0 %v42_v3, %s383_s29 }
  0x33   :  { %113 = vrot.lane.b32.xlu1 %v42_v3, %s384_s30  ;;  %107 = vrot.lane.b32.xlu0 %v42_v3, %s385_s4 }
  0x37   :  { %125 = vrot.lane.b32.xlu1 %v42_v3, %s386_s5  ;;  %119 = vrot.lane.b32.xlu0 %v42_v3, %s387_s6 }
  0x3b   :  { %140 = vrot.lane.b32.xlu1 %v39_v0, %s375_s1  ;;  %131 = vrot.lane.b32.xlu0 %v42_v3, %s388_s7 }
  0x3f   :  { %152 = vrot.lane.b32.xlu1 %v39_v0, %s374_s0  ;;  %146 = vrot.lane.b32.xlu0 %v39_v0, %s377_s23 }
  0x43   :  { %164 = vrot.lane.b32.xlu1 %v39_v0, %s379_s25  ;;  %158 = vrot.lane.b32.xlu0 %v39_v0, %s376_s22 }
  0x47   :  { %176 = vrot.lane.b32.xlu1 %v39_v0, %s381_s27  ;;  %170 = vrot.lane.b32.xlu0 %v39_v0, %s378_s24 }
  0x4b   :  { %188 = vrot.lane.b32.xlu1 %v39_v0, %s383_s29  ;;  %182 = vrot.lane.b32.xlu0 %v39_v0, %s380_s26 }
  0x4f   :  { %200 = vrot.lane.b32.xlu1 %v39_v0, %s385_s4  ;;  %194 = vrot.lane.b32.xlu0 %v39_v0, %s382_s28 }
  0x53   :  { %212 = vrot.lane.b32.xlu1 %v39_v0, %s387_s6  ;;  %206 = vrot.lane.b32.xlu0 %v39_v0, %s384_s30 }
  0x57   :  { %224 = vrot.lane.b32.xlu1 %v39_v0, %s388_s7  ;;  %218 = vrot.lane.b32.xlu0 %v39_v0, %s386_s5 }
  0x91   :  { %v60_v4 = vpop.permute.xlu1 %59  ;;  %v48_v5 = vpop.permute.xlu0 %47 }
  0x92   :  { %63 = vst.msk [vmem:[#allocation7 + $0x18] sm:$0xff] %vm43_vm0, %v60_v4  ;;  %64 = vst.msk [vmem:[#allocation7 + $0x38] sm:$0xff] %vm43_vm0, %v60_v4 }
  0x93   :  { %51 = vst.msk [vmem:[#allocation7 + $0x8] sm:$0xff] %vm43_vm0, %v48_v5  ;;  %52 = vst.msk [vmem:[#allocation7 + $0x28] sm:$0xff] %vm43_vm0, %v48_v5 }
  0x95   :  { %v66_v6 = vpop.permute.xlu1 %65  ;;  %v54_v7 = vpop.permute.xlu0 %53 }
  0x96   :  { %69 = vst.msk [vmem:[#allocation7 + $0x40] sm:$0xff] %vm43_vm0, %v66_v6  ;;  %70 = vst.msk [vmem:[#allocation7 + $0x60] sm:$0xff] %vm43_vm0, %v66_v6 }
  0x97   :  { %57 = vst.msk [vmem:[#allocation7 + $0x10] sm:$0xff] %vm43_vm0, %v54_v7  ;;  %58 = vst.msk [vmem:[#allocation7 + $0x30] sm:$0xff] %vm43_vm0, %v54_v7 }
  0x99   :  { %v78_v8 = vpop.permute.xlu1 %77  ;;  %v72_v9 = vpop.permute.xlu0 %71 }
  0x9a   :  { %81 = vst.msk [vmem:[#allocation7 + $0x50] sm:$0xff] %vm43_vm0, %v78_v8  ;;  %82 = vst.msk [vmem:[#allocation7 + $0x70] sm:$0xff] %vm43_vm0, %v78_v8 }
  0x9b   :  { %75 = vst.msk [vmem:[#allocation7 + $0x48] sm:$0xff] %vm43_vm0, %v72_v9  ;;  %76 = vst.msk [vmem:[#allocation7 + $0x68] sm:$0xff] %vm43_vm0, %v72_v9 }
  0x9d   :  { %v90_v10 = vpop.permute.xlu1 %89  ;;  %v84_v11 = vpop.permute.xlu0 %83 }
  0x9e   :  { %93 = vst.msk [vmem:[#allocation7 + $0x80] sm:$0xff] %vm43_vm0, %v90_v10  ;;  %94 = vst.msk [vmem:[#allocation7 + $0xa0] sm:$0xff] %vm43_vm0, %v90_v10 }
  0x9f   :  { %87 = vst.msk [vmem:[#allocation7 + $0x58] sm:$0xff] %vm43_vm0, %v84_v11  ;;  %88 = vst.msk [vmem:[#allocation7 + $0x78] sm:$0xff] %vm43_vm0, %v84_v11 }
  0xa1   :  { %v102_v12 = vpop.permute.xlu1 %101  ;;  %v96_v13 = vpop.permute.xlu0 %95 }
  0xa2   :  { %105 = vst.msk [vmem:[#allocation7 + $0x90] sm:$0xff] %vm43_vm0, %v102_v12  ;;  %106 = vst.msk [vmem:[#allocation7 + $0xb0] sm:$0xff] %vm43_vm0, %v102_v12 }
  0xa3   :  { %99 = vst.msk [vmem:[#allocation7 + $0x88] sm:$0xff] %vm43_vm0, %v96_v13  ;;  %100 = vst.msk [vmem:[#allocation7 + $0xa8] sm:$0xff] %vm43_vm0, %v96_v13 }
  0xa5   :  { %v114_v14 = vpop.permute.xlu1 %113  ;;  %v108_v15 = vpop.permute.xlu0 %107 }
  0xa6   :  { %117 = vst.msk [vmem:[#allocation7 + $0xc0] sm:$0xff] %vm43_vm0, %v114_v14  ;;  %118 = vst.msk [vmem:[#allocation7 + $0xe0] sm:$0xff] %vm43_vm0, %v114_v14 }
  0xa7   :  { %111 = vst.msk [vmem:[#allocation7 + $0x98] sm:$0xff] %vm43_vm0, %v108_v15  ;;  %112 = vst.msk [vmem:[#allocation7 + $0xb8] sm:$0xff] %vm43_vm0, %v108_v15 }
  0xa9   :  { %v126_v16 = vpop.permute.xlu1 %125  ;;  %v120_v17 = vpop.permute.xlu0 %119 }
  0xaa   :  { %129 = vst.msk [vmem:[#allocation7 + $0xd0] sm:$0xff] %vm43_vm0, %v126_v16  ;;  %130 = vst.msk [vmem:[#allocation7 + $0xf0] sm:$0xff] %vm43_vm0, %v126_v16 }
  0xab   :  { %123 = vst.msk [vmem:[#allocation7 + $0xc8] sm:$0xff] %vm43_vm0, %v120_v17  ;;  %124 = vst.msk [vmem:[#allocation7 + $0xe8] sm:$0xff] %vm43_vm0, %v120_v17 }
  0xad   :  { %v141_v18 = vpop.permute.xlu1 %140  ;;  %v132_v19 = vpop.permute.xlu0 %131 }
  0xae   :  { %144 = vst.msk [vmem:[#allocation8 + $0x8] sm:$0xff] %vm43_vm0, %v141_v18  ;;  %145 = vst.msk [vmem:[#allocation8 + $0x28] sm:$0xff] %vm43_vm0, %v141_v18 }
  0xaf   :  { %135 = vst.msk [vmem:[#allocation7 + $0xd8] sm:$0xff] %vm43_vm0, %v132_v19  ;;  %136 = vst.msk [vmem:[#allocation7 + $0xf8] sm:$0xff] %vm43_vm0, %v132_v19 }
  0xb0   :  { %335 = shalt.err (!%p332_p0)
}
  0xb1   :  { %s390_s11 = smov 128   ;;  %v153_v20 = vpop.permute.xlu1 %152  ;;  %v147_v21 = vpop.permute.xlu0 %146 }
  0xb2   :  { %241 = dma.vmem_to_hbm [thread:$0]  %s236_s9, 4096, %s502_s2, [#allocation4], %s390_s11, %s390_s11, %s388_s7   ;;  %156 = vst.msk [vmem:[#allocation8 + $0x18] sm:$0xff] %vm43_vm0, %v153_v20  ;;  %157 = vst.msk [vmem:[#allocation8 + $0x38] sm:$0xff] %vm43_vm0, %v153_v20 }
  0xb3   :  { %150 = vst.msk [vmem:[#allocation8 + $0x10] sm:$0xff] %vm43_vm0, %v147_v21  ;;  %151 = vst.msk [vmem:[#allocation8 + $0x30] sm:$0xff] %vm43_vm0, %v147_v21  ;;  %s391_s2 = smov [#allocation8]  }
  0xb4   :  { %s247_s14 = sshll.u32 %s391_s2, 4  ;;  %s248_s14 = int_to_ptr.vmem [resolvable:$true] %s247_s14 }
  0xb5   :  { %v165_v22 = vpop.permute.xlu1 %164  ;;  %v159_v23 = vpop.permute.xlu0 %158  ;;  %s344_s15 = scalar_lea.vmem %s248_s14, 4096  ;;  %p349_p2 = scmp.lt.s32.totalorder %s248_s14, %s248_s14 }
  0xb6   :  { %168 = vst.msk [vmem:[#allocation8 + $0x48] sm:$0xff] %vm43_vm0, %v165_v22  ;;  %169 = vst.msk [vmem:[#allocation8 + $0x68] sm:$0xff] %vm43_vm0, %v165_v22  ;;  %p345_p1 = scmp.ne.s32.totalorder %s248_s14, %s344_s15  ;;  %p350_p3 = scmp.lt.s32.totalorder %s344_s15, %s344_s15 }
  0xb7   :  { %162 = vst.msk [vmem:[#allocation8 + $0x40] sm:$0xff] %vm43_vm0, %v159_v23  ;;  %163 = vst.msk [vmem:[#allocation8 + $0x60] sm:$0xff] %vm43_vm0, %v159_v23 }
  0xb8   :  { %p351_p4 = por %p350_p3, %p349_p2 }
  0xb9   :  { %v177_v24 = vpop.permute.xlu1 %176  ;;  %v171_v25 = vpop.permute.xlu0 %170 }
  0xba   :  { %180 = vst.msk [vmem:[#allocation8 + $0x58] sm:$0xff] %vm43_vm0, %v177_v24  ;;  %181 = vst.msk [vmem:[#allocation8 + $0x78] sm:$0xff] %vm43_vm0, %v177_v24  ;;  %p352_p5 = pnand %p351_p4, %p345_p1 }
  0xbb   :  { %174 = vst.msk [vmem:[#allocation8 + $0x50] sm:$0xff] %vm43_vm0, %v171_v25  ;;  %175 = vst.msk [vmem:[#allocation8 + $0x70] sm:$0xff] %vm43_vm0, %v171_v25 }
  0xbd   :  { %v189_v26 = vpop.permute.xlu1 %188  ;;  %v183_v27 = vpop.permute.xlu0 %182 }
  0xbe   :  { %192 = vst.msk [vmem:[#allocation8 + $0x88] sm:$0xff] %vm43_vm0, %v189_v26  ;;  %193 = vst.msk [vmem:[#allocation8 + $0xa8] sm:$0xff] %vm43_vm0, %v189_v26 }
  0xbf   :  { %186 = vst.msk [vmem:[#allocation8 + $0x80] sm:$0xff] %vm43_vm0, %v183_v27  ;;  %187 = vst.msk [vmem:[#allocation8 + $0xa0] sm:$0xff] %vm43_vm0, %v183_v27 }
  0xc1   :  { %v201_v28 = vpop.permute.xlu1 %200  ;;  %v195_v29 = vpop.permute.xlu0 %194 }
  0xc2   :  { %204 = vst.msk [vmem:[#allocation8 + $0x98] sm:$0xff] %vm43_vm0, %v201_v28  ;;  %205 = vst.msk [vmem:[#allocation8 + $0xb8] sm:$0xff] %vm43_vm0, %v201_v28 }
  0xc3   :  { %198 = vst.msk [vmem:[#allocation8 + $0x90] sm:$0xff] %vm43_vm0, %v195_v29  ;;  %199 = vst.msk [vmem:[#allocation8 + $0xb0] sm:$0xff] %vm43_vm0, %v195_v29 }
  0xc5   :  { %v213_v30 = vpop.permute.xlu1 %212  ;;  %v207_v31 = vpop.permute.xlu0 %206 }
  0xc6   :  { %216 = vst.msk [vmem:[#allocation8 + $0xc8] sm:$0xff] %vm43_vm0, %v213_v30  ;;  %217 = vst.msk [vmem:[#allocation8 + $0xe8] sm:$0xff] %vm43_vm0, %v213_v30 }
  0xc7   :  { %210 = vst.msk [vmem:[#allocation8 + $0xc0] sm:$0xff] %vm43_vm0, %v207_v31  ;;  %211 = vst.msk [vmem:[#allocation8 + $0xe0] sm:$0xff] %vm43_vm0, %v207_v31 }
  0xc9   :  { %v225_v32 = vpop.permute.xlu1 %224  ;;  %v219_v33 = vpop.permute.xlu0 %218 }
  0xca   :  { %228 = vst.msk [vmem:[#allocation8 + $0xd8] sm:$0xff] %vm43_vm0, %v225_v32  ;;  %229 = vst.msk [vmem:[#allocation8 + $0xf8] sm:$0xff] %vm43_vm0, %v225_v32 }
  0xcb   :  { %222 = vst.msk [vmem:[#allocation8 + $0xd0] sm:$0xff] %vm43_vm0, %v219_v33  ;;  %223 = vst.msk [vmem:[#allocation8 + $0xf0] sm:$0xff] %vm43_vm0, %v219_v33 }
  0xcc   :  { %355 = shalt.err (!%p352_p5)
}
  0xcd   :  { %253 = dma.vmem_to_hbm [thread:$0]  %s248_s14, 4096, %s503_s3, [#allocation9], %s390_s11, %s390_s11, %s388_s7  }
  0xce   :  { %368 = dma.done.wait [#allocation4], 4096  }
  0xcf   :  { %369 = vsyncadd [#allocation4], 4294963200 }
  0xd0   :  { %370 = dma.done.wait [#allocation9], 4096  }
  0xd1   :  { %371 = vsyncadd [#allocation9], 4294963200 }
  0xd2   :  { %260 = vsyncpa [#allocation3], 1 }
  0xd3   :  { %261 = vsyncpa [#allocation6], 1 }
  0xd4   :  { %262 = vsyncpa [#allocation4], 1 }
  0xd5   :  { %263 = vsyncpa [#allocation9], 1 }

</bundles_post_ra>
